<compile_context>
chip_gen: v7x
topology: tpu7x:2x2x1
jax: 0.10.0
libtpu: 0.0.40
codegen_flags: <defaults>
</compile_context>

<pallas_src>
import functools

import jax
import jax.numpy as jnp
from jax.experimental import pallas as pl
from jax.experimental.pallas import tpu as pltpu

DATA_DIM = 8  # len(columns_used_in_training)


def _generator_kernel(x_ref, wih_ref, whh_ref, b_ref, wlin_ref, blin_ref,
                      out_ref, *, hidden_size, seq_len, batch):
    """Whole forward in one invocation.

    x_ref: (T*B, D) with rows grouped by timestep (rows [t*B, (t+1)*B) = x_t).
    """
    H = hidden_size
    B = batch

    # ---- Hoisted, loop-invariant work -------------------------------------
    w_hh = whh_ref[...]                                      # (H, 4H), pinned
    # Input contribution for ALL timesteps in one MXU pass, bias folded in.
    xg = (jnp.dot(x_ref[...], wih_ref[...],
                  preferred_element_type=jnp.float32)
          + jnp.broadcast_to(b_ref[...], (seq_len * B, 4 * H)))  # (T*B, 4H)

    # ---- Serial recurrence (fully unrolled, static indices) ---------------
    h = jnp.zeros((B, H), jnp.float32)
    c = jnp.zeros((B, H), jnp.float32)
    for t in range(seq_len):  # T is static -> straight-line code
        gates = (xg[t * B:(t + 1) * B, :]
                 + jnp.dot(h, w_hh, preferred_element_type=jnp.float32))
        # Gate columns were reordered at pack time to (i, f, o, g):
        # one sigmoid launch over 3H lanes, one tanh launch over H lanes.
        sig = jax.nn.sigmoid(gates[:, :3 * H])
        i_g = sig[:, 0 * H:1 * H]
        f_g = sig[:, 1 * H:2 * H]
        o_g = sig[:, 2 * H:3 * H]
        g_g = jnp.tanh(gates[:, 3 * H:])

        c = f_g * c + i_g * g_g
        h = o_g * jnp.tanh(c)

    # ---- Final Linear on h_n[-1] -------------------------------------------
    out_ref[...] = (jnp.dot(h, wlin_ref[...],
                            preferred_element_type=jnp.float32)
                    + blin_ref[...]).astype(out_ref.dtype)


@jax.jit
def generator_forward(x, packed):
    """x: (B, T, D) float32.  Returns (B, 1, D), matching PyTorch Generator."""
    B, T, D = x.shape
    H = packed["w_hh_t"].shape[0]

    # Group rows by timestep: (B, T, D) -> (T, B, D) -> (T*B, D).
    x_flat = jnp.transpose(x, (1, 0, 2)).reshape(T * B, D)

    kernel = functools.partial(_generator_kernel,
                               hidden_size=H, seq_len=T, batch=B)

    # Full-extent VMEM blocks for every operand; single kernel invocation.
    out = pl.pallas_call(
        kernel,
        out_shape=jax.ShapeDtypeStruct((B, D), jnp.float32),
        compiler_params=pltpu.CompilerParams(vmem_limit_bytes=32 << 20),
    )(x_flat, packed["w_ih_t"], packed["w_hh_t"], packed["b_gates"],
      packed["w_lin_t"], packed["b_lin"])

    return out.reshape(B, 1, D)


def init_params(key, hidden_size):
    """Raw PyTorch-convention params: uniform(-1/sqrt(H), 1/sqrt(H))."""
    H, D = hidden_size, DATA_DIM
    k = 1.0 / jnp.sqrt(jnp.float32(H))
    ks = jax.random.split(key, 6)
    return {
        "w_ih": jax.random.uniform(ks[0], (4 * H, D), jnp.float32, -k, k),
        "w_hh": jax.random.uniform(ks[1], (4 * H, H), jnp.float32, -k, k),
        "b_ih": jax.random.uniform(ks[2], (4 * H,), jnp.float32, -k, k),
        "b_hh": jax.random.uniform(ks[3], (4 * H,), jnp.float32, -k, k),
        "w_lin": jax.random.uniform(ks[4], (D, H), jnp.float32, -k, k),
        "b_lin": jax.random.uniform(ks[5], (D,), jnp.float32, -k, k),
    }


def pack_params(raw):
    """Kernel-side packing: reorder gates (i,f,g,o)->(i,f,o,g), transpose for
    right-multiply, fuse the two LSTM biases."""
    H = raw["w_hh"].shape[1]

    def reorder(a):  # rows grouped per gate: i | f | g | o  ->  i | f | o | g
        return jnp.concatenate([a[:2 * H], a[3 * H:], a[2 * H:3 * H]], axis=0)

    w_ih = reorder(raw["w_ih"])                   # (4H, D)
    w_hh = reorder(raw["w_hh"])                   # (4H, H)
    b = reorder(raw["b_ih"] + raw["b_hh"])        # (4H,)
    return {
        "w_ih_t": w_ih.T,                         # (D, 4H)
        "w_hh_t": w_hh.T,                         # (H, 4H)
        "b_gates": b[None, :],                    # (1, 4H)
        "w_lin_t": raw["w_lin"].T,                # (H, D)
        "b_lin": raw["b_lin"][None, :],           # (1, D)
    }


def _reference(x, raw):
    """Pure-JAX LSTM reference in the original PyTorch gate order (i,f,g,o)."""
    B, T, D = x.shape
    H = raw["w_hh"].shape[1]
    wih_t, whh_t = raw["w_ih"].T, raw["w_hh"].T
    b = (raw["b_ih"] + raw["b_hh"])[None, :]

    def step(carry, x_t):
        h, c = carry
        g = x_t @ wih_t + h @ whh_t + b
        i = jax.nn.sigmoid(g[:, 0 * H:1 * H])
        f = jax.nn.sigmoid(g[:, 1 * H:2 * H])
        gg = jnp.tanh(g[:, 2 * H:3 * H])
        o = jax.nn.sigmoid(g[:, 3 * H:4 * H])
        c = f * c + i * gg
        h = o * jnp.tanh(c)
        return (h, c), None

    init = (jnp.zeros((B, H), jnp.float32), jnp.zeros((B, H), jnp.float32))
    (h, _), _ = jax.lax.scan(step, init, jnp.transpose(x, (1, 0, 2)))
    return (h @ raw["w_lin"].T + raw["b_lin"][None, :]).reshape(B, 1, D)


if __name__ == "__main__":
    B, T, H = 2, 8, 32  # batch, seq_len, hidden_size

    key = jax.random.PRNGKey(0)
    k_x, k_p = jax.random.split(key)
    x = jax.random.normal(k_x, (B, T, DATA_DIM), jnp.float32)
    raw = init_params(k_p, H)
    packed = pack_params(raw)

    # TODO(synk): nn.Dropout(0.2) treated as eval-mode identity (inference
    # path); the LSTM's dropout arg is a no-op for num_layers=1 anyway.
    out = generator_forward(x, packed)
    out = jax.block_until_ready(out)

    ref = _reference(x, raw)
    assert out.shape == (B, 1, DATA_DIM)
    assert jnp.allclose(out, ref, atol=1e-4), "Pallas kernel mismatch vs reference"

    print("KERNEL_OK")
</pallas_src>

<mosaic_0001>
module attributes {stable_mosaic.version = 11 : i64} {
  func.func @_generator_kernel(%arg0: memref<16x8xf32, #tpu.memory_space<vmem>>, %arg1: memref<8x128xf32, #tpu.memory_space<vmem>>, %arg2: memref<32x128xf32, #tpu.memory_space<vmem>>, %arg3: memref<1x128xf32, #tpu.memory_space<vmem>>, %arg4: memref<32x8xf32, #tpu.memory_space<vmem>>, %arg5: memref<1x8xf32, #tpu.memory_space<vmem>>, %arg6: memref<2x8xf32, #tpu.memory_space<vmem>>) attributes {dimension_semantics = [], scalar_prefetch = 0 : i64, scratch_operands = 0 : i64, tpu.core_type = #tpu.core_type<tc>} {
    %c0 = arith.constant 0 : index
    %c0_0 = arith.constant 0 : index
    %0 = vector.load %arg2[%c0, %c0_0] : memref<32x128xf32, #tpu.memory_space<vmem>>, vector<32x128xf32>
    %c0_1 = arith.constant 0 : index
    %c0_2 = arith.constant 0 : index
    %1 = vector.load %arg0[%c0_1, %c0_2] : memref<16x8xf32, #tpu.memory_space<vmem>>, vector<16x8xf32>
    %c0_3 = arith.constant 0 : index
    %c0_4 = arith.constant 0 : index
    %2 = vector.load %arg1[%c0_3, %c0_4] : memref<8x128xf32, #tpu.memory_space<vmem>>, vector<8x128xf32>
    %cst = arith.constant dense<0.000000e+00> : vector<16x128xf32>
    %3 = tpu.matmul %1, %2, %cst {dimension_numbers = #tpu.dot_dimension_numbers<[1], [0], [0], [1], [0, 0, 1, 1], [], []>} : vector<16x8xf32>, vector<8x128xf32>, vector<16x128xf32> -> vector<16x128xf32>
    %c0_5 = arith.constant 0 : index
    %c0_6 = arith.constant 0 : index
    %4 = vector.load %arg3[%c0_5, %c0_6] : memref<1x128xf32, #tpu.memory_space<vmem>>, vector<1x128xf32>
    %5 = vector.shape_cast %4 : vector<1x128xf32> to vector<1x128xf32>
    %6 = vector.broadcast %5 : vector<1x128xf32> to vector<16x128xf32>
    %7 = arith.addf %3, %6 : vector<16x128xf32>
    %cst_7 = arith.constant 0.000000e+00 : f32
    %8 = vector.broadcast %cst_7 : f32 to vector<2x32xf32>
    %cst_8 = arith.constant 0.000000e+00 : f32
    %9 = vector.broadcast %cst_8 : f32 to vector<2x32xf32>
    %10 = vector.extract_strided_slice %7 {offsets = [0, 0], sizes = [2, 128], strides = [1, 1]} : vector<16x128xf32> to vector<2x128xf32>
    %cst_9 = arith.constant dense<0.000000e+00> : vector<2x128xf32>
    %11 = tpu.matmul %8, %0, %cst_9 {dimension_numbers = #tpu.dot_dimension_numbers<[1], [0], [0], [1], [0, 0, 1, 1], [], []>} : vector<2x32xf32>, vector<32x128xf32>, vector<2x128xf32> -> vector<2x128xf32>
    %12 = arith.addf %10, %11 : vector<2x128xf32>
    %13 = vector.extract_strided_slice %12 {offsets = [0, 0], sizes = [2, 96], strides = [1, 1]} : vector<2x128xf32> to vector<2x96xf32>
    %14 = arith.negf %13 : vector<2x96xf32>
    %15 = math.exp %14 : vector<2x96xf32>
    %cst_10 = arith.constant 1.000000e+00 : f32
    %16 = vector.broadcast %cst_10 : f32 to vector<2x96xf32>
    %17 = arith.addf %16, %15 : vector<2x96xf32>
    %18 = arith.divf %16, %17 : vector<2x96xf32>
    %19 = vector.extract_strided_slice %18 {offsets = [0, 0], sizes = [2, 32], strides = [1, 1]} : vector<2x96xf32> to vector<2x32xf32>
    %20 = vector.extract_strided_slice %18 {offsets = [0, 32], sizes = [2, 32], strides = [1, 1]} : vector<2x96xf32> to vector<2x32xf32>
    %21 = vector.extract_strided_slice %18 {offsets = [0, 64], sizes = [2, 32], strides = [1, 1]} : vector<2x96xf32> to vector<2x32xf32>
    %22 = vector.extract_strided_slice %12 {offsets = [0, 96], sizes = [2, 32], strides = [1, 1]} : vector<2x128xf32> to vector<2x32xf32>
    %23 = math.tanh %22 : vector<2x32xf32>
    %24 = arith.mulf %20, %9 : vector<2x32xf32>
    %25 = arith.mulf %19, %23 : vector<2x32xf32>
    %26 = arith.addf %24, %25 : vector<2x32xf32>
    %27 = math.tanh %26 : vector<2x32xf32>
    %28 = arith.mulf %21, %27 : vector<2x32xf32>
    %29 = vector.extract_strided_slice %7 {offsets = [2, 0], sizes = [2, 128], strides = [1, 1]} : vector<16x128xf32> to vector<2x128xf32>
    %cst_11 = arith.constant dense<0.000000e+00> : vector<2x128xf32>
    %30 = tpu.matmul %28, %0, %cst_11 {dimension_numbers = #tpu.dot_dimension_numbers<[1], [0], [0], [1], [0, 0, 1, 1], [], []>} : vector<2x32xf32>, vector<32x128xf32>, vector<2x128xf32> -> vector<2x128xf32>
    %31 = arith.addf %29, %30 : vector<2x128xf32>
    %32 = vector.extract_strided_slice %31 {offsets = [0, 0], sizes = [2, 96], strides = [1, 1]} : vector<2x128xf32> to vector<2x96xf32>
    %33 = arith.negf %32 : vector<2x96xf32>
    %34 = math.exp %33 : vector<2x96xf32>
    %cst_12 = arith.constant 1.000000e+00 : f32
    %35 = vector.broadcast %cst_12 : f32 to vector<2x96xf32>
    %36 = arith.addf %35, %34 : vector<2x96xf32>
    %37 = arith.divf %35, %36 : vector<2x96xf32>
    %38 = vector.extract_strided_slice %37 {offsets = [0, 0], sizes = [2, 32], strides = [1, 1]} : vector<2x96xf32> to vector<2x32xf32>
    %39 = vector.extract_strided_slice %37 {offsets = [0, 32], sizes = [2, 32], strides = [1, 1]} : vector<2x96xf32> to vector<2x32xf32>
    %40 = vector.extract_strided_slice %37 {offsets = [0, 64], sizes = [2, 32], strides = [1, 1]} : vector<2x96xf32> to vector<2x32xf32>
    %41 = vector.extract_strided_slice %31 {offsets = [0, 96], sizes = [2, 32], strides = [1, 1]} : vector<2x128xf32> to vector<2x32xf32>
    %42 = math.tanh %41 : vector<2x32xf32>
    %43 = arith.mulf %39, %26 : vector<2x32xf32>
    %44 = arith.mulf %38, %42 : vector<2x32xf32>
    %45 = arith.addf %43, %44 : vector<2x32xf32>
    %46 = math.tanh %45 : vector<2x32xf32>
    %47 = arith.mulf %40, %46 : vector<2x32xf32>
    %48 = vector.extract_strided_slice %7 {offsets = [4, 0], sizes = [2, 128], strides = [1, 1]} : vector<16x128xf32> to vector<2x128xf32>
    %cst_13 = arith.constant dense<0.000000e+00> : vector<2x128xf32>
    %49 = tpu.matmul %47, %0, %cst_13 {dimension_numbers = #tpu.dot_dimension_numbers<[1], [0], [0], [1], [0, 0, 1, 1], [], []>} : vector<2x32xf32>, vector<32x128xf32>, vector<2x128xf32> -> vector<2x128xf32>
    %50 = arith.addf %48, %49 : vector<2x128xf32>
    %51 = vector.extract_strided_slice %50 {offsets = [0, 0], sizes = [2, 96], strides = [1, 1]} : vector<2x128xf32> to vector<2x96xf32>
    %52 = arith.negf %51 : vector<2x96xf32>
    %53 = math.exp %52 : vector<2x96xf32>
    %cst_14 = arith.constant 1.000000e+00 : f32
    %54 = vector.broadcast %cst_14 : f32 to vector<2x96xf32>
    %55 = arith.addf %54, %53 : vector<2x96xf32>
    %56 = arith.divf %54, %55 : vector<2x96xf32>
    %57 = vector.extract_strided_slice %56 {offsets = [0, 0], sizes = [2, 32], strides = [1, 1]} : vector<2x96xf32> to vector<2x32xf32>
    %58 = vector.extract_strided_slice %56 {offsets = [0, 32], sizes = [2, 32], strides = [1, 1]} : vector<2x96xf32> to vector<2x32xf32>
    %59 = vector.extract_strided_slice %56 {offsets = [0, 64], sizes = [2, 32], strides = [1, 1]} : vector<2x96xf32> to vector<2x32xf32>
    %60 = vector.extract_strided_slice %50 {offsets = [0, 96], sizes = [2, 32], strides = [1, 1]} : vector<2x128xf32> to vector<2x32xf32>
    %61 = math.tanh %60 : vector<2x32xf32>
    %62 = arith.mulf %58, %45 : vector<2x32xf32>
    %63 = arith.mulf %57, %61 : vector<2x32xf32>
    %64 = arith.addf %62, %63 : vector<2x32xf32>
    %65 = math.tanh %64 : vector<2x32xf32>
    %66 = arith.mulf %59, %65 : vector<2x32xf32>
    %67 = vector.extract_strided_slice %7 {offsets = [6, 0], sizes = [2, 128], strides = [1, 1]} : vector<16x128xf32> to vector<2x128xf32>
    %cst_15 = arith.constant dense<0.000000e+00> : vector<2x128xf32>
    %68 = tpu.matmul %66, %0, %cst_15 {dimension_numbers = #tpu.dot_dimension_numbers<[1], [0], [0], [1], [0, 0, 1, 1], [], []>} : vector<2x32xf32>, vector<32x128xf32>, vector<2x128xf32> -> vector<2x128xf32>
    %69 = arith.addf %67, %68 : vector<2x128xf32>
    %70 = vector.extract_strided_slice %69 {offsets = [0, 0], sizes = [2, 96], strides = [1, 1]} : vector<2x128xf32> to vector<2x96xf32>
    %71 = arith.negf %70 : vector<2x96xf32>
    %72 = math.exp %71 : vector<2x96xf32>
    %cst_16 = arith.constant 1.000000e+00 : f32
    %73 = vector.broadcast %cst_16 : f32 to vector<2x96xf32>
    %74 = arith.addf %73, %72 : vector<2x96xf32>
    %75 = arith.divf %73, %74 : vector<2x96xf32>
    %76 = vector.extract_strided_slice %75 {offsets = [0, 0], sizes = [2, 32], strides = [1, 1]} : vector<2x96xf32> to vector<2x32xf32>
    %77 = vector.extract_strided_slice %75 {offsets = [0, 32], sizes = [2, 32], strides = [1, 1]} : vector<2x96xf32> to vector<2x32xf32>
    %78 = vector.extract_strided_slice %75 {offsets = [0, 64], sizes = [2, 32], strides = [1, 1]} : vector<2x96xf32> to vector<2x32xf32>
    %79 = vector.extract_strided_slice %69 {offsets = [0, 96], sizes = [2, 32], strides = [1, 1]} : vector<2x128xf32> to vector<2x32xf32>
    %80 = math.tanh %79 : vector<2x32xf32>
    %81 = arith.mulf %77, %64 : vector<2x32xf32>
    %82 = arith.mulf %76, %80 : vector<2x32xf32>
    %83 = arith.addf %81, %82 : vector<2x32xf32>
    %84 = math.tanh %83 : vector<2x32xf32>
    %85 = arith.mulf %78, %84 : vector<2x32xf32>
    %86 = vector.extract_strided_slice %7 {offsets = [8, 0], sizes = [2, 128], strides = [1, 1]} : vector<16x128xf32> to vector<2x128xf32>
    %cst_17 = arith.constant dense<0.000000e+00> : vector<2x128xf32>
    %87 = tpu.matmul %85, %0, %cst_17 {dimension_numbers = #tpu.dot_dimension_numbers<[1], [0], [0], [1], [0, 0, 1, 1], [], []>} : vector<2x32xf32>, vector<32x128xf32>, vector<2x128xf32> -> vector<2x128xf32>
    %88 = arith.addf %86, %87 : vector<2x128xf32>
    %89 = vector.extract_strided_slice %88 {offsets = [0, 0], sizes = [2, 96], strides = [1, 1]} : vector<2x128xf32> to vector<2x96xf32>
    %90 = arith.negf %89 : vector<2x96xf32>
    %91 = math.exp %90 : vector<2x96xf32>
    %cst_18 = arith.constant 1.000000e+00 : f32
    %92 = vector.broadcast %cst_18 : f32 to vector<2x96xf32>
    %93 = arith.addf %92, %91 : vector<2x96xf32>
    %94 = arith.divf %92, %93 : vector<2x96xf32>
    %95 = vector.extract_strided_slice %94 {offsets = [0, 0], sizes = [2, 32], strides = [1, 1]} : vector<2x96xf32> to vector<2x32xf32>
    %96 = vector.extract_strided_slice %94 {offsets = [0, 32], sizes = [2, 32], strides = [1, 1]} : vector<2x96xf32> to vector<2x32xf32>
    %97 = vector.extract_strided_slice %94 {offsets = [0, 64], sizes = [2, 32], strides = [1, 1]} : vector<2x96xf32> to vector<2x32xf32>
    %98 = vector.extract_strided_slice %88 {offsets = [0, 96], sizes = [2, 32], strides = [1, 1]} : vector<2x128xf32> to vector<2x32xf32>
    %99 = math.tanh %98 : vector<2x32xf32>
    %100 = arith.mulf %96, %83 : vector<2x32xf32>
    %101 = arith.mulf %95, %99 : vector<2x32xf32>
    %102 = arith.addf %100, %101 : vector<2x32xf32>
    %103 = math.tanh %102 : vector<2x32xf32>
    %104 = arith.mulf %97, %103 : vector<2x32xf32>
    %105 = vector.extract_strided_slice %7 {offsets = [10, 0], sizes = [2, 128], strides = [1, 1]} : vector<16x128xf32> to vector<2x128xf32>
    %cst_19 = arith.constant dense<0.000000e+00> : vector<2x128xf32>
    %106 = tpu.matmul %104, %0, %cst_19 {dimension_numbers = #tpu.dot_dimension_numbers<[1], [0], [0], [1], [0, 0, 1, 1], [], []>} : vector<2x32xf32>, vector<32x128xf32>, vector<2x128xf32> -> vector<2x128xf32>
    %107 = arith.addf %105, %106 : vector<2x128xf32>
    %108 = vector.extract_strided_slice %107 {offsets = [0, 0], sizes = [2, 96], strides = [1, 1]} : vector<2x128xf32> to vector<2x96xf32>
    %109 = arith.negf %108 : vector<2x96xf32>
    %110 = math.exp %109 : vector<2x96xf32>
    %cst_20 = arith.constant 1.000000e+00 : f32
    %111 = vector.broadcast %cst_20 : f32 to vector<2x96xf32>
    %112 = arith.addf %111, %110 : vector<2x96xf32>
    %113 = arith.divf %111, %112 : vector<2x96xf32>
    %114 = vector.extract_strided_slice %113 {offsets = [0, 0], sizes = [2, 32], strides = [1, 1]} : vector<2x96xf32> to vector<2x32xf32>
    %115 = vector.extract_strided_slice %113 {offsets = [0, 32], sizes = [2, 32], strides = [1, 1]} : vector<2x96xf32> to vector<2x32xf32>
    %116 = vector.extract_strided_slice %113 {offsets = [0, 64], sizes = [2, 32], strides = [1, 1]} : vector<2x96xf32> to vector<2x32xf32>
    %117 = vector.extract_strided_slice %107 {offsets = [0, 96], sizes = [2, 32], strides = [1, 1]} : vector<2x128xf32> to vector<2x32xf32>
    %118 = math.tanh %117 : vector<2x32xf32>
    %119 = arith.mulf %115, %102 : vector<2x32xf32>
    %120 = arith.mulf %114, %118 : vector<2x32xf32>
    %121 = arith.addf %119, %120 : vector<2x32xf32>
    %122 = math.tanh %121 : vector<2x32xf32>
    %123 = arith.mulf %116, %122 : vector<2x32xf32>
    %124 = vector.extract_strided_slice %7 {offsets = [12, 0], sizes = [2, 128], strides = [1, 1]} : vector<16x128xf32> to vector<2x128xf32>
    %cst_21 = arith.constant dense<0.000000e+00> : vector<2x128xf32>
    %125 = tpu.matmul %123, %0, %cst_21 {dimension_numbers = #tpu.dot_dimension_numbers<[1], [0], [0], [1], [0, 0, 1, 1], [], []>} : vector<2x32xf32>, vector<32x128xf32>, vector<2x128xf32> -> vector<2x128xf32>
    %126 = arith.addf %124, %125 : vector<2x128xf32>
    %127 = vector.extract_strided_slice %126 {offsets = [0, 0], sizes = [2, 96], strides = [1, 1]} : vector<2x128xf32> to vector<2x96xf32>
    %128 = arith.negf %127 : vector<2x96xf32>
    %129 = math.exp %128 : vector<2x96xf32>
    %cst_22 = arith.constant 1.000000e+00 : f32
    %130 = vector.broadcast %cst_22 : f32 to vector<2x96xf32>
    %131 = arith.addf %130, %129 : vector<2x96xf32>
    %132 = arith.divf %130, %131 : vector<2x96xf32>
    %133 = vector.extract_strided_slice %132 {offsets = [0, 0], sizes = [2, 32], strides = [1, 1]} : vector<2x96xf32> to vector<2x32xf32>
    %134 = vector.extract_strided_slice %132 {offsets = [0, 32], sizes = [2, 32], strides = [1, 1]} : vector<2x96xf32> to vector<2x32xf32>
    %135 = vector.extract_strided_slice %132 {offsets = [0, 64], sizes = [2, 32], strides = [1, 1]} : vector<2x96xf32> to vector<2x32xf32>
    %136 = vector.extract_strided_slice %126 {offsets = [0, 96], sizes = [2, 32], strides = [1, 1]} : vector<2x128xf32> to vector<2x32xf32>
    %137 = math.tanh %136 : vector<2x32xf32>
    %138 = arith.mulf %134, %121 : vector<2x32xf32>
    %139 = arith.mulf %133, %137 : vector<2x32xf32>
    %140 = arith.addf %138, %139 : vector<2x32xf32>
    %141 = math.tanh %140 : vector<2x32xf32>
    %142 = arith.mulf %135, %141 : vector<2x32xf32>
    %143 = vector.extract_strided_slice %7 {offsets = [14, 0], sizes = [2, 128], strides = [1, 1]} : vector<16x128xf32> to vector<2x128xf32>
    %cst_23 = arith.constant dense<0.000000e+00> : vector<2x128xf32>
    %144 = tpu.matmul %142, %0, %cst_23 {dimension_numbers = #tpu.dot_dimension_numbers<[1], [0], [0], [1], [0, 0, 1, 1], [], []>} : vector<2x32xf32>, vector<32x128xf32>, vector<2x128xf32> -> vector<2x128xf32>
    %145 = arith.addf %143, %144 : vector<2x128xf32>
    %146 = vector.extract_strided_slice %145 {offsets = [0, 0], sizes = [2, 96], strides = [1, 1]} : vector<2x128xf32> to vector<2x96xf32>
    %147 = arith.negf %146 : vector<2x96xf32>
    %148 = math.exp %147 : vector<2x96xf32>
    %cst_24 = arith.constant 1.000000e+00 : f32
    %149 = vector.broadcast %cst_24 : f32 to vector<2x96xf32>
    %150 = arith.addf %149, %148 : vector<2x96xf32>
    %151 = arith.divf %149, %150 : vector<2x96xf32>
    %152 = vector.extract_strided_slice %151 {offsets = [0, 0], sizes = [2, 32], strides = [1, 1]} : vector<2x96xf32> to vector<2x32xf32>
    %153 = vector.extract_strided_slice %151 {offsets = [0, 32], sizes = [2, 32], strides = [1, 1]} : vector<2x96xf32> to vector<2x32xf32>
    %154 = vector.extract_strided_slice %151 {offsets = [0, 64], sizes = [2, 32], strides = [1, 1]} : vector<2x96xf32> to vector<2x32xf32>
    %155 = vector.extract_strided_slice %145 {offsets = [0, 96], sizes = [2, 32], strides = [1, 1]} : vector<2x128xf32> to vector<2x32xf32>
    %156 = math.tanh %155 : vector<2x32xf32>
    %157 = arith.mulf %153, %140 : vector<2x32xf32>
    %158 = arith.mulf %152, %156 : vector<2x32xf32>
    %159 = arith.addf %157, %158 : vector<2x32xf32>
    %160 = math.tanh %159 : vector<2x32xf32>
    %161 = arith.mulf %154, %160 : vector<2x32xf32>
    %c0_25 = arith.constant 0 : index
    %c0_26 = arith.constant 0 : index
    %162 = vector.load %arg4[%c0_25, %c0_26] : memref<32x8xf32, #tpu.memory_space<vmem>>, vector<32x8xf32>
    %cst_27 = arith.constant dense<0.000000e+00> : vector<2x8xf32>
    %163 = tpu.matmul %161, %162, %cst_27 {dimension_numbers = #tpu.dot_dimension_numbers<[1], [0], [0], [1], [0, 0, 1, 1], [], []>} : vector<2x32xf32>, vector<32x8xf32>, vector<2x8xf32> -> vector<2x8xf32>
    %c0_28 = arith.constant 0 : index
    %c0_29 = arith.constant 0 : index
    %164 = vector.load %arg5[%c0_28, %c0_29] : memref<1x8xf32, #tpu.memory_space<vmem>>, vector<1x8xf32>
    %165 = vector.broadcast %164 : vector<1x8xf32> to vector<2x8xf32>
    %166 = arith.addf %163, %165 : vector<2x8xf32>
    %c0_30 = arith.constant 0 : index
    %c0_31 = arith.constant 0 : index
    %167 = vector.load %arg6[%c0_30, %c0_31] : memref<2x8xf32, #tpu.memory_space<vmem>>, vector<2x8xf32>
    tpu.vector_store %arg6[%c0_30, %c0_31], %166 {strides = array<i32>} : memref<2x8xf32, #tpu.memory_space<vmem>>, vector<2x8xf32>,
    return
  }
}

</mosaic_0001>

<bundles_post_ra>
// kernel: generator_forward.1
= control target key start
LH: loop header
LB: loop body
LE: loop exit
PB: predicated region body
PF: predicated region fallthrough
CT: control target
= control target key end

     0   :  { %vm38_vm0 = vcmask 64512   ;;  %v1386_v3 = vmov 0.0|0.0   ;;  %s1587_s0 = inlined_call_operand.vmem [shape: f32[16,8], index: 0, kind: input, shape index: {}]   ;;  %s1588_s1 = inlined_call_operand.vmem [shape: f32[8,128], index: 1, kind: input, shape index: {}]   ;;  %s1589_s2 = inlined_call_operand.vmem [shape: f32[32,128], index: 2, kind: input, shape index: {}]   ;;  %s1590_s3 = inlined_call_operand.vmem [shape: f32[1,128], index: 3, kind: input, shape index: {}]   ;;  %s1591_s4 = inlined_call_operand.vmem [shape: f32[32,8], index: 4, kind: input, shape index: {}]   ;;  %s1592_s5 = inlined_call_operand.vmem [shape: f32[1,8], index: 5, kind: input, shape index: {}]   ;;  %s1593_s6 = inlined_call_operand.hbm [shape: f32[2,8], index: 6, kind: output, shape index: {}]  }
   0x1   :  { %v24_v0 = vld [vmem:[%s1589_s2] sm:$0xff]  ;;  %v25_v1 = vld [vmem:[%s1589_s2 + $0x8] sm:$0xff]  ;;  %1238 = vmatprep.subr.bf16.mxu1 %v1386_v3  ;;  %v26_v7 = vld [vmem:[%s1589_s2 + $0x10] sm:$0xff] }
   0x2   :  { %v30_v2 = vld [vmem:[%s1588_s1] sm:$0xff]  ;;  %v1437_v4 = vpack.c.bf16 %v25_v1, %v24_v0  ;;  %v29_v6 = vld [vmem:[%s1587_s0 + $0x8] sm:$0xff]  ;;  %v27_v8 = vld [vmem:[%s1589_s2 + $0x18] sm:$0xff] }
   0x3   :  { %1134 = vmatprep.subr.mxu0 %v30_v2  ;;  %v28_v5 = vld [vmem:[%s1587_s0] sm:$0xff] }
   0x4   :  { %1135 = vmatpush3.msra.mxu0 %v30_v2  ;;  %1136 = vmatprep.mubr.msk.f32.mxu0 %vm38_vm0, %v28_v5 }
   0x5   :  { %11 = vsyncpa [#allocation3], 0  ;;  %1240 = vmatpush3.bf16.msra.mxu1 %v1437_v4  ;;  %1137 = vmatmul.mubr.msk.f32.vlgmr.msra.gmra.mrb[0].mxu0 %vm38_vm0, %v29_v6  ;;  %v1452_v9 = vpack.c.bf16 %v27_v8, %v26_v7  ;;  %vm1387_vm1 = vmmov 0   ;;  %v1388_v10 = vmov 0.0   ;;  %v1066_v11 = vld [vmem:[%s1590_s3] ss:$0 sm:$0xff] }
   0x6   :  { %1241 = vmatprep.subr.bf16.mxu1 %v1386_v3  ;;  %1147 = vmatprep.mubr.msk.f32.mxu1 %vm1387_vm1, %v1388_v10  ;;  %s1389_s10 = smov 32   ;;  %s1390_s3 = smov 64   ;;  %vm120_vm2 = vcmask 261120   ;;  %vm1050_vm3 = vcmask 58368  }
   0x7   :  { %1244 = vmatprep.subr.bf16.mxu0 %v1386_v3  ;;  %1158 = vmatprep.mubr.msk.f32.mxu0 %vm1387_vm1, %v1388_v10 }
   0x8   :  { %1246 = vmatpush3.bf16.msra.mxu0 %v1437_v4 }
   0x9   :  { %1243 = vmatpush3.bf16.msra.mxu1 %v1452_v9  ;;  %1247 = vmatprep.subr.bf16.mxu0 %v1386_v3 }
   0xa   :  { %1250 = vmatprep.subr.bf16.mxu1 %v1386_v3 }
   0xc   :  { %1148 = vmatmul.mubr.f32.vlgmr.msra.gmra.mrb[0].mxu1 %v1388_v10  ;;  %1249 = vmatpush3.bf16.msra.mxu0 %v1452_v9 }
   0xd   :  { %1252 = vmatpush3.bf16.msra.mxu1 %v1437_v4  ;;  %1169 = vmatprep.mubr.msk.f32.mxu1 %vm1387_vm1, %v1388_v10 }
   0xe   :  { %1253 = vmatprep.subr.bf16.mxu1 %v1386_v3  ;;  %1256 = vmatprep.subr.bf16.mxu0 %v1386_v3 }
  0x11   :  { %1255 = vmatpush3.bf16.msra.mxu1 %v1452_v9 }
  0x12   :  { %1262 = vmatprep.subr.bf16.mxu1 %v1386_v3 }
  0xd8   :  { %v1138_v12 = vpop.f32.mrb[0].mxu0 }
  0xd9   :  { %v1476_v13 = vadd.f32 %v1138_v12, %v1066_v11  ;;  %v111_v14 = vpop.f32.mrb[1].mxu0 }
  0xda   :  { %v1478_v15 = vadd.f32 %v1066_v11, %v111_v14 }
  0xdf   :  { %v190_v16 = vpop.f32.mrb[0].mxu1 }
  0xe0   :  { %v194_v17 = vadd.f32 %v190_v16, %v1478_v15  ;;  %v1149_v18 = vpop.f32.mrb[1].mxu1 }
  0xe2   :  { %1298 = vtanh.f32 %v194_v17  ;;  %v1069_v20 = vmul.f32 -1.442695, %v194_v17 }
  0xe4   :  { %1300 = vpow2.f32 %v1069_v20 }
  0xec   :  { %v1299_v19 = vpop.eup %1298 }
  0xed   :  { %204 = vrot.lane.b32.xlu0 %v1299_v19, %s1389_s10 }
  0xee   :  { %v1301_v21 = vpop.eup %1300 }
  0xef   :  { %v198_v22 = vadd.f32 1.0, %v1301_v21 }
  0xf1   :  { %1302 = vrcp.f32 %v198_v22 }
  0xfb   :  { %v1303_v23 = vpop.eup %1302 }
  0xfc   :  { %v202_v26 = vmul.f32 0.0, %v1303_v23 }
 0x15f   :  { %v205_v24 = vpop.permute.xlu0 %204 }
 0x160   :  { %v207_v25 = vmul.f32 %v1303_v23, %v205_v24 }
 0x162   :  { %209 = vrot.lane.b32.xlu0 %v207_v25, %s1389_s10 }
 0x1d4   :  { %v210_v27 = vpop.permute.xlu0 %209 }
 0x1d5   :  { %v212_v28 = vadd.f32 %v210_v27, %v202_v26 }
 0x1d7   :  { %1304 = vtanh.f32 %v212_v28  ;;  %v306_v44 = vrot.slane %v212_v28, 6 }
 0x1e1   :  { %v1305_v29 = vpop.eup %1304 }
 0x1e2   :  { %215 = vrot.lane.b32.xlu1 %v1305_v29, %s1389_s10 }
 0x254   :  { %v216_v30 = vpop.permute.xlu1 %215 }
 0x255   :  { %v218_v31 = vmul.f32 %v1303_v23, %v216_v30 }
 0x257   :  { %220 = vrot.lane.b32.xlu1 %v218_v31, %s1390_s3 }
 0x2c9   :  { %v221_v32 = vpop.permute.xlu1 %220 }
 0x2ca   :  { %1159 = vmatmul.mubr.msk.f32.vlgmr.msra.gmra.mrb[2].mxu0 %vm120_vm2, %v221_v32 }
 0x2cb   :  { %1258 = vmatpush3.bf16.msra.mxu0 %v1437_v4  ;;  %1180 = vmatprep.mubr.msk.f32.mxu0 %vm1387_vm1, %v1388_v10 }
 0x2cc   :  { %1259 = vmatprep.subr.bf16.mxu0 %v1386_v3 }
 0x2cf   :  { %1261 = vmatpush3.bf16.msra.mxu0 %v1452_v9 }
 0x2d0   :  { %1268 = vmatprep.subr.bf16.mxu0 %v1386_v3 }
 0x39d   :  { %v290_v33 = vpop.f32.mrb[2].mxu0 }
 0x39e   :  { %v295_v34 = vrot.slane %v290_v33, 6  ;;  %v1160_v35 = vpop.f32.mrb[3].mxu0 }
 0x3a0   :  { %v297_v36 = vadd.f32 %v295_v34, %v1478_v15 }
 0x3a2   :  { %1306 = vtanh.f32 %v297_v36  ;;  %v1071_v38 = vmul.f32 -1.442695, %v297_v36 }
 0x3a4   :  { %1308 = vpow2.f32 %v1071_v38 }
 0x3ac   :  { %v1307_v37 = vpop.eup %1306 }
 0x3ad   :  { %310 = vrot.lane.b32.xlu0 %v1307_v37, %s1389_s10 }
 0x3ae   :  { %v1309_v39 = vpop.eup %1308 }
 0x3af   :  { %v301_v40 = vadd.f32 1.0, %v1309_v39 }
 0x3b1   :  { %1310 = vrcp.f32 %v301_v40 }
 0x3bb   :  { %v1311_v41 = vpop.eup %1310 }
 0x3bc   :  { %v308_v45 = vmul.f32 %v1311_v41, %v306_v44 }
 0x41f   :  { %v311_v42 = vpop.permute.xlu0 %310 }
 0x420   :  { %v313_v43 = vmul.f32 %v1311_v41, %v311_v42 }
 0x422   :  { %315 = vrot.lane.b32.xlu1 %v313_v43, %s1389_s10 }
 0x494   :  { %v316_v46 = vpop.permute.xlu1 %315 }
 0x495   :  { %v318_v47 = vadd.f32 %v316_v46, %v308_v45 }
 0x497   :  { %1312 = vtanh.f32 %v318_v47  ;;  %v413_v0 = vrot.slane %v318_v47, 6 }
 0x4a1   :  { %v1313_v48 = vpop.eup %1312 }
 0x4a2   :  { %321 = vrot.lane.b32.xlu0 %v1313_v48, %s1389_s10 }
 0x514   :  { %v322_v49 = vpop.permute.xlu0 %321 }
 0x515   :  { %v324_v50 = vmul.f32 %v1311_v41, %v322_v49 }
 0x517   :  { %v326_v51 = vrot.slane %v324_v50, 2 }
 0x519   :  { %327 = vrot.lane.b32.xlu1 %v326_v51, %s1390_s3 }
 0x58b   :  { %v328_v52 = vpop.permute.xlu1 %327 }
 0x58c   :  { %1170 = vmatmul.mubr.msk.f32.vlgmr.msra.gmra.mrb[2].mxu1 %vm120_vm2, %v328_v52 }
 0x58d   :  { %1264 = vmatpush3.bf16.msra.mxu1 %v1437_v4  ;;  %1191 = vmatprep.mubr.msk.f32.mxu1 %vm1387_vm1, %v1388_v10 }
 0x58e   :  { %1265 = vmatprep.subr.bf16.mxu1 %v1386_v3 }
 0x591   :  { %1267 = vmatpush3.bf16.msra.mxu1 %v1452_v9 }
 0x592   :  { %1274 = vmatprep.subr.bf16.mxu1 %v1386_v3 }
 0x65f   :  { %v397_v53 = vpop.f32.mrb[2].mxu1 }
 0x660   :  { %v402_v54 = vrot.slane %v397_v53, 4  ;;  %v1171_v55 = vpop.f32.mrb[3].mxu1 }
 0x662   :  { %v404_v56 = vadd.f32 %v402_v54, %v1478_v15 }
 0x664   :  { %1314 = vtanh.f32 %v404_v56  ;;  %v1073_v58 = vmul.f32 -1.442695, %v404_v56 }
 0x666   :  { %1316 = vpow2.f32 %v1073_v58 }
 0x66e   :  { %v1315_v57 = vpop.eup %1314 }
 0x66f   :  { %417 = vrot.lane.b32.xlu0 %v1315_v57, %s1389_s10 }
 0x670   :  { %v1317_v59 = vpop.eup %1316 }
 0x671   :  { %v408_v60 = vadd.f32 1.0, %v1317_v59 }
 0x673   :  { %1318 = vrcp.f32 %v408_v60 }
 0x67d   :  { %v1319_v61 = vpop.eup %1318 }
 0x67e   :  { %v415_v1 = vmul.f32 %v1319_v61, %v413_v0 }
 0x6e1   :  { %v418_v62 = vpop.permute.xlu0 %417 }
 0x6e2   :  { %v420_v63 = vmul.f32 %v1319_v61, %v418_v62 }
 0x6e4   :  { %422 = vrot.lane.b32.xlu1 %v420_v63, %s1389_s10 }
 0x756   :  { %v423_v2 = vpop.permute.xlu1 %422 }
 0x757   :  { %v425_v5 = vadd.f32 %v423_v2, %v415_v1 }
 0x759   :  { %1320 = vtanh.f32 %v425_v5  ;;  %v520_v26 = vrot.slane %v425_v5, 6 }
 0x763   :  { %v1321_v6 = vpop.eup %1320 }
 0x764   :  { %428 = vrot.lane.b32.xlu0 %v1321_v6, %s1389_s10 }
 0x7d6   :  { %v429_v7 = vpop.permute.xlu0 %428 }
 0x7d7   :  { %v431_v8 = vmul.f32 %v1319_v61, %v429_v7 }
 0x7d9   :  { %v433_v11 = vrot.slane %v431_v8, 4 }
 0x7db   :  { %434 = vrot.lane.b32.xlu1 %v433_v11, %s1390_s3 }
 0x84d   :  { %v435_v12 = vpop.permute.xlu1 %434 }
 0x84e   :  { %1181 = vmatmul.mubr.msk.f32.vlgmr.msra.gmra.mrb[4].mxu0 %vm120_vm2, %v435_v12 }
 0x84f   :  { %1270 = vmatpush3.bf16.msra.mxu0 %v1437_v4  ;;  %1202 = vmatprep.mubr.msk.f32.mxu0 %vm1387_vm1, %v1388_v10 }
 0x850   :  { %1271 = vmatprep.subr.bf16.mxu0 %v1386_v3 }
 0x853   :  { %1273 = vmatpush3.bf16.msra.mxu0 %v1452_v9 }
 0x854   :  { %1280 = vmatprep.subr.bf16.mxu0 %v1386_v3 }
 0x921   :  { %v504_v14 = vpop.f32.mrb[4].mxu0 }
 0x922   :  { %v509_v16 = vrot.slane %v504_v14, 2  ;;  %v1182_v17 = vpop.f32.mrb[5].mxu0 }
 0x924   :  { %v511_v18 = vadd.f32 %v509_v16, %v1478_v15 }
 0x926   :  { %1322 = vtanh.f32 %v511_v18  ;;  %v1075_v20 = vmul.f32 -1.442695, %v511_v18 }
 0x928   :  { %1324 = vpow2.f32 %v1075_v20 }
 0x930   :  { %v1323_v19 = vpop.eup %1322 }
 0x931   :  { %524 = vrot.lane.b32.xlu0 %v1323_v19, %s1389_s10 }
 0x932   :  { %v1325_v21 = vpop.eup %1324 }
 0x933   :  { %v515_v22 = vadd.f32 1.0, %v1325_v21 }
 0x935   :  { %1326 = vrcp.f32 %v515_v22 }
 0x93f   :  { %v1327_v23 = vpop.eup %1326 }
 0x940   :  { %v522_v27 = vmul.f32 %v1327_v23, %v520_v26 }
 0x9a3   :  { %v525_v24 = vpop.permute.xlu0 %524 }
 0x9a4   :  { %v527_v25 = vmul.f32 %v1327_v23, %v525_v24 }
 0x9a6   :  { %529 = vrot.lane.b32.xlu1 %v527_v25, %s1389_s10 }
 0xa18   :  { %v530_v28 = vpop.permute.xlu1 %529 }
 0xa19   :  { %v532_v29 = vadd.f32 %v530_v28, %v522_v27 }
 0xa1b   :  { %1328 = vtanh.f32 %v532_v29  ;;  %v624_v44 = vrot.slane %v532_v29, 6 }
 0xa25   :  { %v1329_v15 = vpop.eup %1328 }
 0xa26   :  { %535 = vrot.lane.b32.xlu0 %v1329_v15, %s1389_s10 }
 0xa98   :  { %v536_v30 = vpop.permute.xlu0 %535 }
 0xa99   :  { %v538_v31 = vmul.f32 %v1327_v23, %v536_v30 }
 0xa9b   :  { %v540_v32 = vrot.slane %v538_v31, 6 }
 0xa9d   :  { %541 = vrot.lane.b32.xlu1 %v540_v32, %s1390_s3 }
 0xb0f   :  { %v542_v33 = vpop.permute.xlu1 %541 }
 0xb10   :  { %1192 = vmatmul.mubr.msk.f32.vlgmr.msra.gmra.mrb[4].mxu1 %vm120_vm2, %v542_v33 }
 0xb11   :  { %1276 = vmatpush3.bf16.msra.mxu1 %v1437_v4  ;;  %1213 = vmatprep.mubr.msk.f32.mxu1 %vm1387_vm1, %v1388_v10 }
 0xb12   :  { %1277 = vmatprep.subr.bf16.mxu1 %v1386_v3 }
 0xb15   :  { %1279 = vmatpush3.bf16.msra.mxu1 %v1452_v9 }
 0xb16   :  { %1286 = vmatprep.subr.bf16.mxu1 %v1386_v3 }
 0xbe3   :  { %v611_v34 = vpop.f32.mrb[4].mxu1 }
 0xbe4   :  { %v615_v35 = vadd.f32 %v611_v34, %v1476_v13  ;;  %v1193_v36 = vpop.f32.mrb[5].mxu1 }
 0xbe6   :  { %1330 = vtanh.f32 %v615_v35  ;;  %v1077_v38 = vmul.f32 -1.442695, %v615_v35 }
 0xbe8   :  { %1332 = vpow2.f32 %v1077_v38 }
 0xbf0   :  { %v1331_v37 = vpop.eup %1330 }
 0xbf1   :  { %628 = vrot.lane.b32.xlu0 %v1331_v37, %s1389_s10 }
 0xbf2   :  { %v1333_v39 = vpop.eup %1332 }
 0xbf3   :  { %v619_v40 = vadd.f32 1.0, %v1333_v39 }
 0xbf5   :  { %1334 = vrcp.f32 %v619_v40 }
 0xbff   :  { %v1335_v41 = vpop.eup %1334 }
 0xc00   :  { %v626_v45 = vmul.f32 %v1335_v41, %v624_v44 }
 0xc63   :  { %v629_v42 = vpop.permute.xlu0 %628 }
 0xc64   :  { %v631_v43 = vmul.f32 %v1335_v41, %v629_v42 }
 0xc66   :  { %633 = vrot.lane.b32.xlu1 %v631_v43, %s1389_s10 }
 0xcd8   :  { %v634_v46 = vpop.permute.xlu1 %633 }
 0xcd9   :  { %v636_v47 = vadd.f32 %v634_v46, %v626_v45  ;;  %v964_v45 = vld [vmem:[%s1591_s4 + $0x8] sm:$0xff]  ;;  %v965_v46 = vld [vmem:[%s1591_s4 + $0x10] sm:$0xff] }
 0xcdb   :  { %1336 = vtanh.f32 %v636_v47 }
 0xce5   :  { %v1337_v48 = vpop.eup %1336 }
 0xce6   :  { %639 = vrot.lane.b32.xlu0 %v1337_v48, %s1389_s10  ;;  %v966_v48 = vld [vmem:[%s1591_s4 + $0x18] sm:$0xff] }
 0xd58   :  { %v640_v49 = vpop.permute.xlu0 %639 }
 0xd59   :  { %v642_v50 = vmul.f32 %v1335_v41, %v640_v49  ;;  %v1290_v49 = vpack.c.bf16 %v966_v48, %v965_v46 }
 0xd5b   :  { %644 = vrot.lane.b32.xlu1 %v642_v50, %s1390_s3 }
 0xdcd   :  { %v645_v51 = vpop.permute.xlu1 %644 }
 0xdce   :  { %1203 = vmatmul.mubr.msk.f32.vlgmr.msra.gmra.mrb[6].mxu0 %vm120_vm2, %v645_v51 }
 0xdcf   :  { %1282 = vmatpush3.bf16.msra.mxu0 %v1437_v4  ;;  %1224 = vmatprep.mubr.msk.f32.mxu0 %vm1387_vm1, %v1388_v10 }
 0xdd0   :  { %1283 = vmatprep.subr.bf16.mxu0 %v1386_v3 }
 0xdd3   :  { %1285 = vmatpush3.bf16.msra.mxu0 %v1452_v9  ;;  %v730_v9 = vrot.slane %v636_v47, 6 }
 0xea1   :  { %v714_v52 = vpop.f32.mrb[6].mxu0 }
 0xea2   :  { %v719_v53 = vrot.slane %v714_v52, 6  ;;  %v1204_v54 = vpop.f32.mrb[7].mxu0 }
 0xea4   :  { %v721_v55 = vadd.f32 %v719_v53, %v1476_v13 }
 0xea6   :  { %1338 = vtanh.f32 %v721_v55  ;;  %v1079_v57 = vmul.f32 -1.442695, %v721_v55  ;;  %v1084_v55 = vld [vmem:[%s1592_s5] ss:$0 sm:$0xff] }
 0xea8   :  { %1340 = vpow2.f32 %v1079_v57 }
 0xeb0   :  { %v1339_v56 = vpop.eup %1338 }
 0xeb1   :  { %734 = vrot.lane.b32.xlu0 %v1339_v56, %s1389_s10 }
 0xeb2   :  { %v1341_v58 = vpop.eup %1340 }
 0xeb3   :  { %v725_v4 = vadd.f32 1.0, %v1341_v58 }
 0xeb5   :  { %1342 = vrcp.f32 %v725_v4 }
 0xebf   :  { %v1343_v59 = vpop.eup %1342 }
 0xec0   :  { %v732_v62 = vmul.f32 %v1343_v59, %v730_v9 }
 0xf23   :  { %v735_v60 = vpop.permute.xlu0 %734 }
 0xf24   :  { %v737_v61 = vmul.f32 %v1343_v59, %v735_v60 }
 0xf26   :  { %739 = vrot.lane.b32.xlu1 %v737_v61, %s1389_s10 }
 0xf98   :  { %v740_v63 = vpop.permute.xlu1 %739 }
 0xf99   :  { %v742_v0 = vadd.f32 %v740_v63, %v732_v62 }
 0xf9b   :  { %1344 = vtanh.f32 %v742_v0 }
 0xfa5   :  { %v1345_v1 = vpop.eup %1344 }
 0xfa6   :  { %745 = vrot.lane.b32.xlu0 %v1345_v1, %s1389_s10 }
0x1018   :  { %v746_v2 = vpop.permute.xlu0 %745 }
0x1019   :  { %v748_v5 = vmul.f32 %v1343_v59, %v746_v2 }
0x101b   :  { %v750_v6 = vrot.slane %v748_v5, 2 }
0x101d   :  { %751 = vrot.lane.b32.xlu1 %v750_v6, %s1390_s3 }
0x108f   :  { %v752_v7 = vpop.permute.xlu1 %751 }
0x1090   :  { %1214 = vmatmul.mubr.msk.f32.vlgmr.msra.gmra.mrb[6].mxu1 %vm120_vm2, %v752_v7 }
0x1091   :  { %1235 = vmatprep.mubr.msk.f32.mxu1 %vm1387_vm1, %v1388_v10  ;;  %v837_v10 = vrot.slane %v742_v0, 6 }
0x1163   :  { %v821_v8 = vpop.f32.mrb[6].mxu1 }
0x1164   :  { %v826_v11 = vrot.slane %v821_v8, 4  ;;  %v1215_v12 = vpop.f32.mrb[7].mxu1 }
0x1166   :  { %v828_v14 = vadd.f32 %v826_v11, %v1476_v13 }
0x1168   :  { %1346 = vtanh.f32 %v828_v14  ;;  %v1081_v17 = vmul.f32 -1.442695, %v828_v14 }
0x116a   :  { %1348 = vpow2.f32 %v1081_v17 }
0x1172   :  { %v1347_v16 = vpop.eup %1346 }
0x1173   :  { %841 = vrot.lane.b32.xlu0 %v1347_v16, %s1389_s10 }
0x1174   :  { %v1349_v18 = vpop.eup %1348 }
0x1175   :  { %v832_v19 = vadd.f32 1.0, %v1349_v18 }
0x1177   :  { %1350 = vrcp.f32 %v832_v19 }
0x1181   :  { %v1351_v20 = vpop.eup %1350 }
0x1182   :  { %v839_v23 = vmul.f32 %v1351_v20, %v837_v10 }
0x11e5   :  { %v842_v21 = vpop.permute.xlu0 %841 }
0x11e6   :  { %v844_v22 = vmul.f32 %v1351_v20, %v842_v21 }
0x11e8   :  { %846 = vrot.lane.b32.xlu1 %v844_v22, %s1389_s10 }
0x125a   :  { %v847_v24 = vpop.permute.xlu1 %846 }
0x125b   :  { %v849_v25 = vadd.f32 %v847_v24, %v839_v23 }
0x125d   :  { %1352 = vtanh.f32 %v849_v25  ;;  %v944_v41 = vrot.slane %v849_v25, 6 }
0x1267   :  { %v1353_v26 = vpop.eup %1352 }
0x1268   :  { %852 = vrot.lane.b32.xlu0 %v1353_v26, %s1389_s10 }
0x12da   :  { %v853_v27 = vpop.permute.xlu0 %852 }
0x12db   :  { %v855_v28 = vmul.f32 %v1351_v20, %v853_v27 }
0x12dd   :  { %v857_v29 = vrot.slane %v855_v28, 4 }
0x12df   :  { %858 = vrot.lane.b32.xlu1 %v857_v29, %s1390_s3 }
0x1351   :  { %v859_v15 = vpop.permute.xlu1 %858 }
0x1352   :  { %1225 = vmatmul.mubr.msk.f32.vlgmr.msra.gmra.mrb[8].mxu0 %vm120_vm2, %v859_v15 }
0x1425   :  { %v928_v30 = vpop.f32.mrb[8].mxu0 }
0x1426   :  { %v933_v31 = vrot.slane %v928_v30, 2  ;;  %v1226_v32 = vpop.f32.mrb[9].mxu0 }
0x1428   :  { %v935_v33 = vadd.f32 %v933_v31, %v1476_v13  ;;  %v963_v13 = vld [vmem:[%s1591_s4] sm:$0xff]  ;;  %s1391_s4 = smov [#allocation2]  }
0x1429   :  { %v1287_v47 = vpack.c.bf16 %v964_v45, %v963_v13  ;;  %s1058_s21 = sshll.u32 %s1391_s4, 4  ;;  %s1059_s21 = int_to_ptr.vmem [resolvable:$true] %s1058_s21 }
0x142a   :  { %1354 = vtanh.f32 %v935_v33  ;;  %v1083_v35 = vmul.f32 -1.442695, %v935_v33  ;;  %s1362_s22 = scalar_lea.vmem %s1059_s21, 32  ;;  %p1367_p1 = scmp.lt.s32.totalorder %s1059_s21, %s1059_s21 }
0x142b   :  { %1288 = vmatpush3.bf16.msra.mxu1 %v1287_v47  ;;  %p1363_p0 = scmp.ne.s32.totalorder %s1059_s21, %s1362_s22  ;;  %p1368_p2 = scmp.lt.s32.totalorder %s1362_s22, %s1362_s22 }
0x142c   :  { %1356 = vpow2.f32 %v1083_v35  ;;  %1289 = vmatprep.subr.bf16.mxu1 %v1386_v3 }
0x142d   :  { %p1369_p3 = por %p1368_p2, %p1367_p1 }
0x142f   :  { %1291 = vmatpush3.bf16.msra.mxu1 %v1290_v49  ;;  %p1370_p4 = pnand %p1369_p3, %p1363_p0 }
0x1434   :  { %v1355_v34 = vpop.eup %1354 }
0x1435   :  { %948 = vrot.lane.b32.xlu0 %v1355_v34, %s1389_s10 }
0x1436   :  { %v1357_v36 = vpop.eup %1356 }
0x1437   :  { %v939_v37 = vadd.f32 1.0, %v1357_v36 }
0x1439   :  { %1358 = vrcp.f32 %v939_v37 }
0x1443   :  { %v1359_v38 = vpop.eup %1358 }
0x1444   :  { %v946_v42 = vmul.f32 %v1359_v38, %v944_v41 }
0x14a7   :  { %v949_v39 = vpop.permute.xlu0 %948 }
0x14a8   :  { %v951_v40 = vmul.f32 %v1359_v38, %v949_v39 }
0x14aa   :  { %953 = vrot.lane.b32.xlu1 %v951_v40, %s1389_s10 }
0x151c   :  { %v954_v43 = vpop.permute.xlu1 %953 }
0x151d   :  { %v956_v44 = vadd.f32 %v954_v43, %v946_v42 }
0x151f   :  { %1360 = vtanh.f32 %v956_v44 }
0x1529   :  { %v1361_v50 = vpop.eup %1360 }
0x152a   :  { %959 = vrot.lane.b32.xlu0 %v1361_v50, %s1389_s10 }
0x159c   :  { %v960_v51 = vpop.permute.xlu0 %959 }
0x159d   :  { %v962_v52 = vmul.f32 %v1359_v38, %v960_v51 }
0x159f   :  { %v975_v53 = vrot.slane %v962_v52, 6 }
0x15a1   :  { %976 = vrot.lane.b32.xlu1 %v975_v53, %s1390_s3 }
0x1613   :  { %v977_v54 = vpop.permute.xlu1 %976 }
0x1614   :  { %1236 = vmatmul.mubr.msk.f32.vlgmr.msra.gmra.mrb[8].mxu1 %vm120_vm2, %v977_v54 }
0x16e7   :  { %v1046_v56 = vpop.f32.mrb[8].mxu1 }
0x16e8   :  { %v1047_v3 = vadd.f32 %v1084_v55, %v1046_v56  ;;  %v1237_v57 = vpop.f32.mrb[9].mxu1 }
0x16ea   :  { %1051 = vst.msk [vmem:[#allocation2] sm:$0x3] %vm1050_vm3, %v1047_v3 }
0x16eb   :  { %1373 = shalt.err (!%p1370_p4)
}
0x16ec   :  { %s1374_s25 = scalar_lea.hbm %s1593_s6, 32 }
0x16ed   :  { %p1375_p5 = scmp.ne.s32.totalorder %s1593_s6, %s1374_s25  ;;  %p1378_p6 = scmp.lt.u32.totalorder %s1374_s25, %s1593_s6 }
0x16ef   :  { %p1380_p7 = pnand %p1378_p6, %p1375_p5 }
0x16f1   :  { %1383 = shalt.err (!%p1380_p7)
}
0x16f2   :  { %1061 = dma.vmem_to_hbm [thread:$0]  %s1059_s21, 32, %s1593_s6, [#allocation3]  }
0x16f3   :  { %1384 = dma.done.wait [#allocation3], 32  }
0x16f4   :  { %1385 = vsyncadd [#allocation3], 4294967264 }
0x16f5   :  { %1065 = vsyncpa [#allocation3], 1 }

</bundles_post_ra>
